<compile_context>
chip_gen: v7x
topology: tpu7x:2x2x1
jax: 0.10.0
libtpu: 0.0.40
codegen_flags: <defaults>
</compile_context>

<pallas_src>
import functools

import jax
import jax.numpy as jnp
from jax.experimental import pallas as pl
from jax.experimental.pallas import tpu as pltpu


def _round_up(x, m):
    return (x + m - 1) // m * m


def _cdiv(a, b):
    return (a + b - 1) // b


def _vmem_capacity_bytes():
    try:
        return int(pltpu.get_tpu_info().vmem_capacity_bytes)
    except Exception:
        return 64 << 20          # conservative default = v7x (64 MiB per TC)


def _largest_chunk(c_pad):
    # Largest multiple of 8 that is <= 64 and divides c_pad (c_pad % 8 == 0).
    for cand in range(min(64, c_pad), 7, -8):
        if c_pad % cand == 0:
            return cand
    return 8


def _pointer_kernel(enc_ref, dec_ref, v_ref, bias_ref, out_ref, *,
                    c_on_lanes, n_chunks, chunk, tanh_dtype):
    """One (block_b, block_d) tile of the pointer-attention forward.

    c_on_lanes=True  : enc (Bt, E8, Cp)  dec (Bt, Td, Cp)  v (1, Cp)   slab (Bt,Td,E8,cc)
    c_on_lanes=False : enc (Bt, C8, Ep)  dec (Bt, Td, C8)  v (C8, 1)   slab (Bt,Td,cc,Ep)
    bias/out         : (Bt, Td, Kp)  with Kp = E8 or Ep (E on lanes of the output).
    """
    f32 = jnp.float32
    Bt, Td, _ = dec_ref.shape
    Kp = out_ref.shape[-1]

    # Chunked reduction over C: only one (Bt, Td, <=chunk, Kp)-sized tanh slab
    # is live at a time.  n_chunks is a static Python int -> fully unrolled.
    prod = jnp.zeros((Bt, Td, Kp), f32)
    for ci in range(n_chunks):
        lo = ci * chunk
        hi = lo + chunk
        dec_c = dec_ref[:, :, lo:hi]                            # (Bt, Td, cc)
        if c_on_lanes:
            # slab layout: E on sublanes, C-chunk on lanes.
            enc_c = enc_ref[:, :, lo:hi]                        # (Bt, Kp, cc)
            s = enc_c[:, None, :, :] + dec_c[:, :, None, :]     # (Bt, Td, Kp, cc)
            t = jnp.tanh(s.astype(tanh_dtype)).astype(f32)
            v_c = v_ref[:, lo:hi]                               # (1, cc)
            prod = prod + jnp.sum(t * v_c[None, None, :, :], axis=-1)
        else:
            # slab layout: C-chunk on sublanes, E on lanes.
            enc_c = enc_ref[:, lo:hi, :]                        # (Bt, cc, Kp)
            s = enc_c[:, None, :, :] + dec_c[:, :, :, None]     # (Bt, Td, cc, Kp)
            t = jnp.tanh(s.astype(tanh_dtype)).astype(f32)
            v_c = v_ref[lo:hi, :]                               # (cc, 1)
            prod = prod + jnp.sum(t * v_c[None, None, :, :], axis=2)

    # masked log-softmax over E.  bias already holds log(mask + eps) for valid
    # positions and -1e30 for padded encoder columns (excluded from normaliser).
    logits = prod + bias_ref[...]
    m = jnp.max(logits, axis=-1, keepdims=True)
    z = logits - m
    lse = jnp.log(jnp.sum(jnp.exp(z), axis=-1, keepdims=True))
    out_ref[...] = (z - lse).astype(out_ref.dtype)


def pointer_network(x_decoder, x_encoder, mask, w1, w2, v, eps=1e-16,
                    use_bf16_tanh=False):
    """Forward pass of PointerNetwork.  Weights in PyTorch (out, in) layout."""
    B, D, C = x_decoder.shape
    _, E, _ = x_encoder.shape
    f32 = jnp.float32
    hp = jax.lax.Precision.HIGHEST

    # ---- choose which axis of the dominant tanh slab sits on lanes ---------
    # vreg count per (b, d) row of the slab under each orientation.
    vregs_c_on_lanes = _cdiv(E, 8) * _cdiv(C, 128)   # E sublanes, C lanes
    vregs_e_on_lanes = _cdiv(C, 8) * _cdiv(E, 128)   # C sublanes, E lanes
    c_on_lanes = vregs_c_on_lanes < vregs_e_on_lanes

    # ---- precompute the linear projections once (XLA, full f32) ------------
    dec = jnp.einsum("bdk,ck->bdc", x_decoder.astype(f32), w2.astype(f32),
                     precision=hp)                               # (B, D, C)
    if c_on_lanes:
        enc = jnp.einsum("bek,ck->bec", x_encoder.astype(f32), w1.astype(f32),
                         precision=hp)                           # (B, E, C)
    else:
        enc = jnp.einsum("bek,ck->bce", x_encoder.astype(f32), w1.astype(f32),
                         precision=hp)                           # (B, C, E)

    # bias = log(mask + eps) exactly (matches the reference for soft masks too);
    # padded encoder columns get -1e30 so they never touch the softmax.
    bias = jnp.log(mask.astype(f32) + eps)                       # (B, D, E)

    # ---- padded extents & reduction chunking --------------------------------
    if c_on_lanes:
        C_pad = _round_up(C, 128)        # C on lanes
        K_pad = _round_up(E, 8)          # E on sublanes / output minor dim
        chunk = min(C_pad, 128)
    else:
        C_pad = _round_up(C, 8)          # C on sublanes
        K_pad = _round_up(E, 128)        # E on lanes (lane-dense output)
        chunk = _largest_chunk(C_pad)
    n_chunks = C_pad // chunk

    # ---- generation-aware VMEM budget & tile sizing --------------------------
    phys_vmem = _vmem_capacity_bytes()
    limit_cap = int(min(phys_vmem * 3 // 4, 96 << 20))   # ~48 MiB v7x, ~96 MiB v5e/v6e
    budget = int(limit_cap * 0.7)

    def est_bytes(bb, bd):
        return 4 * (2 * bb * C_pad * K_pad          # enc block (double-buffered)
                    + 2 * bb * bd * C_pad           # dec block (double-buffered)
                    + 4 * bb * bd * K_pad           # bias + out (double-buffered)
                    + 4 * bb * bd * K_pad           # prod / logits / softmax temps
                    + 6 * bb * bd * chunk * K_pad   # per-chunk tanh temps (+overlap)
                    + 2 * max(C_pad, 128))          # v

    bd = _round_up(D, 8)
    while bd > 8 and est_bytes(1, bd) > budget:
        bd = _round_up(max(8, bd // 2), 8)
    Dp = _round_up(D, bd)

    bb = 1
    if Dp // bd == 1 and B > 1:
        # D fits in one tile: grow the batch tile, but keep >= 2 grid steps so
        # v7x megacore can still split the (parallel, parallel) grid.
        cap = max(1, B // 2)
        for cand in range(cap, 0, -1):
            if B % cand == 0 and est_bytes(cand, bd) <= budget:
                bb = cand
                break

    # ---- zero / -inf padding (all padded regions are inert) -----------------
    dec_p = jnp.zeros((B, Dp, C_pad), f32).at[:, :D, :C].set(dec)
    if c_on_lanes:
        enc_p = jnp.zeros((B, K_pad, C_pad), f32).at[:, :E, :C].set(enc)
        v_p = jnp.zeros((1, C_pad), f32).at[:, :C].set(v.astype(f32).reshape(1, C))
        enc_spec = pl.BlockSpec((bb, K_pad, C_pad), lambda b, d: (b, 0, 0))
        v_spec = pl.BlockSpec((1, C_pad), lambda b, d: (0, 0))
    else:
        enc_p = jnp.zeros((B, C_pad, K_pad), f32).at[:, :C, :E].set(enc)
        v_p = jnp.zeros((C_pad, 1), f32).at[:C, :].set(v.astype(f32).reshape(C, 1))
        enc_spec = pl.BlockSpec((bb, C_pad, K_pad), lambda b, d: (b, 0, 0))
        v_spec = pl.BlockSpec((C_pad, 1), lambda b, d: (0, 0))
    bias_p = jnp.full((B, Dp, K_pad), -1e30, f32).at[:, :D, :E].set(bias)

    kernel = functools.partial(
        _pointer_kernel,
        c_on_lanes=c_on_lanes,
        n_chunks=n_chunks,
        chunk=chunk,
        tanh_dtype=jnp.bfloat16 if use_bf16_tanh else f32)

    out_padded = pl.pallas_call(
        kernel,
        out_shape=jax.ShapeDtypeStruct((B, Dp, K_pad), f32),
        grid_spec=pltpu.PrefetchScalarGridSpec(
            num_scalar_prefetch=0,
            grid=(B // bb, Dp // bd),
            in_specs=[
                enc_spec,                                                    # enc
                pl.BlockSpec((bb, bd, C_pad), lambda b, d: (b, d, 0)),       # dec
                v_spec,                                                      # v
                pl.BlockSpec((bb, bd, K_pad), lambda b, d: (b, d, 0)),       # bias
            ],
            out_specs=pl.BlockSpec((bb, bd, K_pad), lambda b, d: (b, d, 0)),
        ),
        compiler_params=pltpu.CompilerParams(
            dimension_semantics=("parallel", "parallel"),
            vmem_limit_bytes=limit_cap),
    )(enc_p, dec_p, v_p, bias_p)

    return out_padded[:, :D, :E]


def pointer_network_ref(x_decoder, x_encoder, mask, w1, w2, v, eps=1e-16):
    hp = jax.lax.Precision.HIGHEST
    enc = jnp.einsum("bek,ck->bec", x_encoder, w1, precision=hp)   # (B, E, C)
    dec = jnp.einsum("bdk,ck->bdc", x_decoder, w2, precision=hp)   # (B, D, C)
    t = jnp.tanh(enc[:, None, :, :] + dec[:, :, None, :])          # (B, D, E, C)
    prod = jnp.einsum("bdec,c->bde", t, v[0], precision=hp)
    x = prod + jnp.log(mask.astype(jnp.float32) + eps)
    return jax.nn.log_softmax(x, axis=-1)


if __name__ == "__main__":
    B, D, E, C = 2, 8, 16, 32   # batch, decoder len, encoder len, n_hidden

    key = jax.random.PRNGKey(0)
    k_xd, k_xe, k_m, k_w1, k_w2, k_v = jax.random.split(key, 6)

    x_decoder = jax.random.normal(k_xd, (B, D, C), dtype=jnp.float32)
    x_encoder = jax.random.normal(k_xe, (B, E, C), dtype=jnp.float32)
    mask = (jax.random.uniform(k_m, (B, D, E)) < 0.7).astype(jnp.float32)
    mask = mask.at[:, :, 0].set(1.0)   # at least one valid position per row

    # Deterministic "Linear(bias=False)" weights, PyTorch (out, in) layout.
    scale = 1.0 / jnp.sqrt(jnp.float32(C))
    w1 = jax.random.normal(k_w1, (C, C), dtype=jnp.float32) * scale
    w2 = jax.random.normal(k_w2, (C, C), dtype=jnp.float32) * scale
    v = jax.random.normal(k_v, (1, C), dtype=jnp.float32) * scale

    out = pointer_network(x_decoder, x_encoder, mask, w1, w2, v)
    out = jax.block_until_ready(out)

    ref = pointer_network_ref(x_decoder, x_encoder, mask, w1, w2, v)
    assert out.shape == (B, D, E)
    assert jnp.allclose(out, ref, atol=1e-4, rtol=1e-4), (
        float(jnp.max(jnp.abs(out - ref))))

    print("KERNEL_OK")
</pallas_src>

<mosaic_0001>
module attributes {stable_mosaic.version = 11 : i64} {
  func.func @_pointer_kernel(%arg0: i32, %arg1: i32, %arg2: memref<1x16x128xf32, #tpu.memory_space<vmem>>, %arg3: memref<1x8x128xf32, #tpu.memory_space<vmem>>, %arg4: memref<1x128xf32, #tpu.memory_space<vmem>>, %arg5: memref<1x8x16xf32, #tpu.memory_space<vmem>>, %arg6: memref<1x8x16xf32, #tpu.memory_space<vmem>>) attributes {dimension_semantics = [#tpu.dimension_semantics<parallel>, #tpu.dimension_semantics<parallel>], iteration_bounds = array<i64: 2, 1>, scalar_prefetch = 0 : i64, scratch_operands = 0 : i64, tpu.core_type = #tpu.core_type<tc>, window_params = [{transform_indices = @transform_0, window_bounds = array<i64: 1, 16, 128>}, {transform_indices = @transform_1, window_bounds = array<i64: 1, 8, 128>}, {pipeline_mode = #tpu.pipeline_mode<synchronous>, transform_indices = @transform_2, window_bounds = array<i64: 1, 128>}, {transform_indices = @transform_3, window_bounds = array<i64: 1, 8, 16>}, {transform_indices = @transform_4, window_bounds = array<i64: 1, 8, 16>}]} {
    %cst = arith.constant 0.000000e+00 : f32
    %0 = vector.broadcast %cst : f32 to vector<1x8x16xf32>
    %c0 = arith.constant 0 : index
    %c0_0 = arith.constant 0 : index
    %c0_1 = arith.constant 0 : index
    %1 = vector.load %arg3[%c0, %c0_0, %c0_1] : memref<1x8x128xf32, #tpu.memory_space<vmem>>, vector<1x8x128xf32>
    %c0_2 = arith.constant 0 : index
    %c0_3 = arith.constant 0 : index
    %c0_4 = arith.constant 0 : index
    %2 = vector.load %arg2[%c0_2, %c0_3, %c0_4] : memref<1x16x128xf32, #tpu.memory_space<vmem>>, vector<1x16x128xf32>
    %3 = vector.shape_cast %2 : vector<1x16x128xf32> to vector<1x1x16x128xf32>
    %4 = vector.shape_cast %1 : vector<1x8x128xf32> to vector<1x8x1x128xf32>
    %5 = vector.broadcast %3 : vector<1x1x16x128xf32> to vector<1x8x16x128xf32>
    %6 = vector.broadcast %4 : vector<1x8x1x128xf32> to vector<1x8x16x128xf32>
    %7 = arith.addf %5, %6 : vector<1x8x16x128xf32>
    %8 = math.tanh %7 : vector<1x8x16x128xf32>
    %c0_5 = arith.constant 0 : index
    %c0_6 = arith.constant 0 : index
    %9 = vector.load %arg4[%c0_5, %c0_6] : memref<1x128xf32, #tpu.memory_space<vmem>>, vector<1x128xf32>
    %10 = vector.shape_cast %9 : vector<1x128xf32> to vector<1x1x1x128xf32>
    %11 = vector.broadcast %10 : vector<1x1x1x128xf32> to vector<1x8x16x128xf32>
    %12 = arith.mulf %8, %11 : vector<1x8x16x128xf32>
    %cst_7 = arith.constant dense<0.000000e+00> : vector<1x8x16xf32>
    %13 = vector.multi_reduction <add>, %12, %cst_7 [3] : vector<1x8x16x128xf32> to vector<1x8x16xf32>
    %14 = arith.addf %0, %13 : vector<1x8x16xf32>
    %c0_8 = arith.constant 0 : index
    %c0_9 = arith.constant 0 : index
    %c0_10 = arith.constant 0 : index
    %15 = vector.load %arg5[%c0_8, %c0_9, %c0_10] : memref<1x8x16xf32, #tpu.memory_space<vmem>>, vector<1x8x16xf32>
    %16 = arith.addf %14, %15 : vector<1x8x16xf32>
    %cst_11 = arith.constant dense<0xFF800000> : vector<1x8xf32>
    %17 = vector.multi_reduction <maximumf>, %16, %cst_11 [2] : vector<1x8x16xf32> to vector<1x8xf32>
    %18 = vector.shape_cast %17 : vector<1x8xf32> to vector<1x8x1xf32>
    %19 = vector.broadcast %18 : vector<1x8x1xf32> to vector<1x8x16xf32>
    %20 = arith.subf %16, %19 : vector<1x8x16xf32>
    %21 = math.exp %20 : vector<1x8x16xf32>
    %cst_12 = arith.constant dense<0.000000e+00> : vector<1x8xf32>
    %22 = vector.multi_reduction <add>, %21, %cst_12 [2] : vector<1x8x16xf32> to vector<1x8xf32>
    %23 = vector.shape_cast %22 : vector<1x8xf32> to vector<1x8x1xf32>
    %24 = math.log %23 : vector<1x8x1xf32>
    %25 = vector.broadcast %24 : vector<1x8x1xf32> to vector<1x8x16xf32>
    %26 = arith.subf %20, %25 : vector<1x8x16xf32>
    %c0_13 = arith.constant 0 : index
    %c0_14 = arith.constant 0 : index
    %c0_15 = arith.constant 0 : index
    %27 = vector.load %arg6[%c0_13, %c0_14, %c0_15] : memref<1x8x16xf32, #tpu.memory_space<vmem>>, vector<1x8x16xf32>
    tpu.vector_store %arg6[%c0_13, %c0_14, %c0_15], %26 {strides = array<i32>} : memref<1x8x16xf32, #tpu.memory_space<vmem>>, vector<1x8x16xf32>,
    return
  }
  func.func @transform_0(%arg0: i32, %arg1: i32) -> (i32, i32, i32) {
    %c0_i32 = arith.constant 0 : i32
    %c0_i32_0 = arith.constant 0 : i32
    %c0_i32_1 = arith.constant 0 : i32
    return %arg0, %c0_i32, %c0_i32_0 : i32, i32, i32
  }
  func.func @transform_1(%arg0: i32, %arg1: i32) -> (i32, i32, i32) {
    %c0_i32 = arith.constant 0 : i32
    %c0_i32_0 = arith.constant 0 : i32
    return %arg0, %arg1, %c0_i32 : i32, i32, i32
  }
  func.func @transform_2(%arg0: i32, %arg1: i32) -> (i32, i32) {
    %c0_i32 = arith.constant 0 : i32
    %c0_i32_0 = arith.constant 0 : i32
    %c0_i32_1 = arith.constant 0 : i32
    return %c0_i32, %c0_i32_0 : i32, i32
  }
  func.func @transform_3(%arg0: i32, %arg1: i32) -> (i32, i32, i32) {
    %c0_i32 = arith.constant 0 : i32
    %c0_i32_0 = arith.constant 0 : i32
    return %arg0, %arg1, %c0_i32 : i32, i32, i32
  }
  func.func @transform_4(%arg0: i32, %arg1: i32) -> (i32, i32, i32) {
    %c0_i32 = arith.constant 0 : i32
    %c0_i32_0 = arith.constant 0 : i32
    return %arg0, %arg1, %c0_i32 : i32, i32, i32
  }
}

</mosaic_0001>

<bundles_post_ra>
// kernel: tpu_custom_call.1
= control target key start
LH: loop header
LB: loop body
LE: loop exit
PB: predicated region body
PF: predicated region fallthrough
CT: control target
= control target key end

     0   :  { %s2333_s0 = inlined_call_operand.hbm [shape: f32[2,16,128], index: 0, kind: input, shape index: {}]   ;;  %s2334_s1 = inlined_call_operand.hbm [shape: f32[2,8,128], index: 1, kind: input, shape index: {}]   ;;  %s2335_s2 = inlined_call_operand.vmem [shape: f32[1,128], index: 2, kind: input, shape index: {}]   ;;  %s2336_s3 = inlined_call_operand.hbm [shape: f32[2,8,16], index: 3, kind: input, shape index: {}]   ;;  %s2337_s4 = inlined_call_operand.hbm [shape: f32[2,8,16], index: 4, kind: output, shape index: {}]  }
   0x1   :  { %2345 = sst [smem:[#allocation16_spill]] %s2333_s0 }
   0x2   :  { %2346 = sst [smem:[#allocation17_spill]] %s2334_s1 }
   0x3   :  { %9 = vsyncpa [#allocation3], 0 }
   0x4   :  { %11 = vsyncpa [#allocation3 + $0x1], 0 }
   0x5   :  { %12 = vsyncpa [#allocation6], 0 }
   0x6   :  { %14 = vsyncpa [#allocation6 + $0x1], 0 }
   0x7   :  { %15 = vsyncpa [#allocation4], 0 }
   0x8   :  { %17 = vsyncpa [#allocation4 + $0x1], 0  ;;  %s1741_s15 = smov 0   ;;  %s1743_s16 = smov 0  }
   0x9   :  { %s1745_s17 = smov 0   ;;  %s1747_s18 = smov 0  }
   0xa   :  { %s1749_s19 = smov 0   ;;  %s1751_s20 = smov 0  }
   0xb LB: > { %2347 = sst [smem:[#allocation12_spill]] %s1694_s17  ;;  %s1772_s21 = sadd.s32 4294967295, %s1706_s20   ;;  %s1706_s20 = sphi %s1751_s20, %s23_s20   ;;  %s1702_s19 = sphi %s1749_s19, %s2370_s19   ;;  %s1698_s18 = sphi %s1747_s18, %s2369_s18   ;;  %s1694_s17 = sphi %s1745_s17, %s2368_s17   ;;  %s1690_s16 = sphi %s1743_s16, %s2372_s16   ;;  %s1686_s15 = sphi %s1741_s15, %s2371_s15  }
   0xc   : > { %2348 = sst [smem:[#allocation13_spill]] %s1702_s19  ;;  %s1364_s22 = sadd.s32 4294967294, %s1706_s20  }
   0xd   : > { %s35_s23 = sadd.s32 1, %s1702_s19  ;;  %s42_s24 = sadd.s32 1, %s1694_s17 }
   0xe   : > { %p37_p0 = scmp.ge.s32.totalorder %s35_s23, 2  ;;  %p49_p1 = scmp.ne.s32.totalorder %s1694_s17, %s1690_s16 }
   0xf   : > { %p50_p2 = scmp.eq.s32.totalorder %s1706_s20, 0  ;;  %p55_p3 = scmp.ne.s32.totalorder %s1690_s16, %s1686_s15 }
  0x10   : > { %s2374_s23 = smov (%p37_p0, %s35_s23), 0  ;;  %p56_p5 = scmp.eq.s32.totalorder %s1772_s21, 0 }
  0x11   : > { %2349 = sst [smem:[#allocation14_spill]] %s2374_s23  ;;  %p1784_p4 = por %p50_p2, %p49_p1 }
  0x12   : > { %s39_s26 = ssub.s32 %s1702_s19, %s2374_s23  ;;  %p158_p6 = scmp.eq.s32.totalorder %s1772_s21, 1 }
  0x13   : > { %p40_p7 = scmp.eq.s32.totalorder %s39_s26, 0  ;;  %p1792_p8 = por %p56_p5, %p55_p3 }
  0x14   : > { %p1796_p9 = por %p158_p6, %p49_p1  ;;  %p164_p10 = scmp.eq.s32.totalorder %s1364_s22, 1 }
  0x15   : > { %s2351_s27 = scalar_select %p1792_p8, 1, 0 }
  0x16   : > { %s2352_s28 = scalar_select %p1796_p9, 1, 0 }
  0x17   : > { %s1801_s29 = scalar_select %p40_p7, %s1694_s17, %s42_s24  }
  0x18   : > { %p1803_p11 = por %p164_p10, %p55_p3  ;;  %p1407_p13 = scmp.lt.s32.totalorder %s1706_s20, 2 }
  0x19   : > { %2353 = sst [smem:[#allocation15_spill]] %s1801_s29  ;;  %s1810_s5 = sand.u32 1, %s1694_s17  }
  0x1a   : > { %s2354_s30 = scalar_select %p1803_p11, 1, 0 }
  0x1b   : > { %s208_s6 = sand.u32 1, %s1706_s20   ;;  %s2339_s7 = sshll.u32 %s1810_s5, 3 }
  0x1c   : > { %p1816_p0 = pnand %p1407_p13, %p1784_p4  ;;  %s1371_s9 = sshll.u32 %s1702_s19, 7 }
  0x1d   : > { %s2356_s1 = sld [smem:[#allocation17_spill]]  ;;  %s212_s13 = scalar_lea.vmem [#allocation5], %s2339_s7 }
  0x1e   : > { %s2355_s8 = scalar_select %p1816_p0, 1, 0 }
  0x1f   : > { %s220_s14 = sshll.u32 %s212_s13, 4  ;;  %s1833_s25 = scalar_lea.hbm %s2336_s3, %s1371_s9  ;;  %s1828_s14 = int_to_ptr.vmem [resolvable:$true] %s220_s14 }
  0x20   : > { %s1835_s26 = scalar_lea.sflag [#allocation6], %s208_s6  ;;  %p1841_p2 = pneg %p1816_p0 }
  0x23   : > { %s1824_s12 = scalar_lea.hbm %s2356_s1, %s1371_s9  ;;  %s1535_s7 = scalar_lea.hbm %s2356_s1, 256 }
  0x24   : > { %s1530_s23 = scalar_lea.hbm %s1824_s12, 128  ;;  %p1536_p5 = scmp.lt.u32.totalorder %s1824_s12, %s2356_s1 }
  0x25   : > { %p1531_p1 = scmp.ne.s32.totalorder %s1824_s12, %s1530_s23  ;;  %p1537_p6 = scmp.lt.u32.totalorder %s1535_s7, %s1530_s23 }
  0x26   : > { %p1539_p10 = scmp.lt.u32.totalorder %s1530_s23, %s1824_s12 }
  0x27   : > { %p1533_p3 = pnand %p1841_p2, %p1531_p1  ;;  %p1538_p7 = por %p1537_p6, %p1536_p5 }
  0x29   : > { %p1534_p4 = pneg %p1533_p3  ;;  %p1540_p13 = por %p1539_p10, %p1538_p7 }
  0x2b   : > { %p1541_p12 = pnand %p1540_p13, %p1534_p4 }
  0x2d   : > { %1544 = shalt.err (!%p1541_p12)
}
  0x2e   : > { %s1545_s6 = scalar_lea.vmem %s1828_s14, 128  ;;  %s1708_s24 = smov [#allocation5]  }
  0x2f   : > { %p1546_p1 = scmp.ne.s32.totalorder %s1828_s14, %s1545_s6  ;;  %s1550_s11 = sshll.u32 %s1708_s24, 4  ;;  %s1551_s11 = int_to_ptr.vmem [resolvable:$false] %s1550_s11 }
  0x30   : > { %s1552_s13 = scalar_lea.vmem %s1551_s11, 256  ;;  %p1553_p9 = scmp.lt.s32.totalorder %s1828_s14, %s1551_s11 }
  0x31   : > { %p1548_p3 = pnand %p1546_p1, %p1841_p2  ;;  %p1554_p8 = scmp.lt.s32.totalorder %s1552_s13, %s1545_s6 }
  0x33   : > { %p1549_p11 = pneg %p1548_p3  ;;  %p1555_p5 = por %p1554_p8, %p1553_p9 }
  0x35   : > { %p1556_p6 = pnand %p1555_p5, %p1549_p11 }
  0x37   : > { %1559 = shalt.err (!%p1556_p6)
}
  0x38   : > { %1399 = dma.hbm_to_vmem [thread:$0]  (!%p1816_p0), %s1824_s12, 128, %s1828_s14, %s1835_s26  }
  0x39   : > { %p1374_p12 = scmp.ge.s32.totalorder %s1706_s20, 1  ;;  %p244_p4 = scmp.lt.s32.totalorder %s1706_s20, 3 }
  0x3a   : > { %s1367_s7 = sshll.u32 %s1810_s5, 4  ;;  %s1384_s22 = sshll.u32 %s1702_s19, 8 }
  0x3b   : > { %p1867_p7 = pnand %p1374_p12, %p244_p4  ;;  %s2359_s0 = sld [smem:[#allocation16_spill]] }
  0x3c   : > { %s191_s11 = scalar_lea.vmem [#allocation2], %s1367_s7  ;;  %s188_s12 = scalar_lea.sflag [#allocation3], %s1810_s5 }
  0x3d   : > { %s2358_s23 = scalar_select %p1867_p7, 1, 0 }
  0x3e   : > { %s198_s13 = sshll.u32 %s191_s11, 4  ;;  %s1878_s13 = int_to_ptr.vmem [resolvable:$true] %s198_s13 }
  0x41   : > { %s1876_s24 = scalar_lea.hbm %s2359_s0, %s1384_s22  ;;  %s1565_s9 = scalar_lea.hbm %s2359_s0, 512 }
  0x42   : > { %s1560_s14 = scalar_lea.hbm %s1876_s24, 256  ;;  %p1566_p10 = scmp.lt.u32.totalorder %s1876_s24, %s2359_s0 }
  0x43   : > { %p1561_p8 = scmp.ne.s32.totalorder %s1876_s24, %s1560_s14  ;;  %p1567_p13 = scmp.lt.u32.totalorder %s1565_s9, %s1560_s14 }
  0x44   : > { %p1569_p3 = scmp.lt.u32.totalorder %s1560_s14, %s1876_s24 }
  0x45   : > { %p1563_p9 = pnand %p1561_p8, %p1841_p2  ;;  %p1568_p1 = por %p1567_p13, %p1566_p10 }
  0x47   : > { %p1564_p11 = pneg %p1563_p9  ;;  %p1570_p5 = por %p1569_p3, %p1568_p1 }
  0x49   : > { %p1571_p6 = pnand %p1570_p5, %p1564_p11 }
  0x4b   : > { %1574 = shalt.err (!%p1571_p6)
}
  0x4c   : > { %s1575_s7 = scalar_lea.vmem %s1878_s13, 256  ;;  %s1709_s1 = smov [#allocation2]  }
  0x4d   : > { %p1576_p12 = scmp.ne.s32.totalorder %s1878_s13, %s1575_s7  ;;  %s1580_s19 = sshll.u32 %s1709_s1, 4  ;;  %s1581_s19 = int_to_ptr.vmem [resolvable:$false] %s1580_s19 }
  0x4e   : > { %s1582_s11 = scalar_lea.vmem %s1581_s19, 512  ;;  %p1583_p9 = scmp.lt.s32.totalorder %s1878_s13, %s1581_s19 }
  0x4f   : > { %p1578_p4 = pnand %p1576_p12, %p1841_p2  ;;  %p1584_p7 = scmp.lt.s32.totalorder %s1582_s11, %s1575_s7 }
  0x51   : > { %p1579_p8 = pneg %p1578_p4  ;;  %p1585_p10 = por %p1584_p7, %p1583_p9 }
  0x53   : > { %p1586_p13 = pnand %p1585_p10, %p1579_p8 }
  0x55   : > { %1589 = shalt.err (!%p1586_p13)
}
  0x56   : > { %s1710_s14 = smov 128   ;;  %s1711_s9 = smov 8  }
  0x57   : > { %1396 = dma.hbm_to_vmem [thread:$0]  (!%p1816_p0), %s1876_s24, 256, %s1878_s13, %s188_s12, %s1710_s14, %s1710_s14, %s1711_s9  }
  0x58   : > { %s2360_s22 = sshll.u32 %s1810_s5, 3  ;;  %s1590_s1 = scalar_lea.hbm %s1833_s25, 128 }
  0x59   : > { %s231_s6 = scalar_lea.vmem [#allocation7], %s2360_s22  ;;  %p1591_p7 = scmp.ne.s32.totalorder %s1833_s25, %s1590_s1 }
  0x5a   : > { %s239_s7 = sshll.u32 %s231_s6, 4  ;;  %s1595_s0 = scalar_lea.hbm %s2336_s3, 256  ;;  %s240_s7 = int_to_ptr.vmem [resolvable:$true] %s239_s7 }
  0x5b   : > { %p1593_p11 = pnand %p1591_p7, %p1841_p2  ;;  %p1596_p3 = scmp.lt.u32.totalorder %s1833_s25, %s2336_s3 }
  0x5c   : > { %p1597_p5 = scmp.lt.u32.totalorder %s1595_s0, %s1590_s1  ;;  %p1599_p12 = scmp.lt.u32.totalorder %s1590_s1, %s1833_s25 }
  0x5d   : > { %p1594_p1 = pneg %p1593_p11 }
  0x5e   : > { %p1598_p6 = por %p1597_p5, %p1596_p3 }
  0x60   : > { %p1600_p4 = por %p1599_p12, %p1598_p6 }
  0x62   : > { %p1601_p8 = pnand %p1600_p4, %p1594_p1 }
  0x64   : > { %1604 = shalt.err (!%p1601_p8)
}
  0x65   : > { %s1605_s5 = scalar_lea.vmem %s240_s7, 128  ;;  %s1712_s24 = smov [#allocation7]  }
  0x66   : > { %p1606_p9 = scmp.ne.s32.totalorder %s240_s7, %s1605_s5  ;;  %s1610_s13 = sshll.u32 %s1712_s24, 4  ;;  %s1611_s13 = int_to_ptr.vmem [resolvable:$false] %s1610_s13 }
  0x67   : > { %s1612_s12 = scalar_lea.vmem %s1611_s13, 256  ;;  %p1613_p7 = scmp.lt.s32.totalorder %s240_s7, %s1611_s13 }
  0x68   : > { %p1608_p10 = pnand %p1606_p9, %p1841_p2  ;;  %p1614_p11 = scmp.lt.s32.totalorder %s1612_s12, %s1605_s5 }
  0x6a   : > { %p1609_p13 = pneg %p1608_p10  ;;  %p1615_p0 = por %p1614_p11, %p1613_p7 }
  0x6c   : > { %p1616_p3 = pnand %p1615_p0, %p1609_p13 }
  0x6e   : > { %1619 = shalt.err (!%p1616_p3)
}
  0x6f   : > { %p2361_p5 = scmp.ne.s32.totalorder %s2355_s8, 0  ;;  %p2362_p1 = scmp.ne.s32.totalorder %s2358_s23, 0 }
  0x70   : > { %s1927_s0 = sand.u32 (!%p2362_p1), 1, %s1690_s16   ;;  %p2363_p2 = scmp.ne.s32.totalorder (!%p2362_p1), %s2351_s27, 0 }
  0x71   : > { %1402 = dma.hbm_to_vmem [thread:$0]  (!%p2361_p5), %s1833_s25, 128, %s240_s7, %s1835_s26  }
  0x72   : > { %248 = sbr.rel (%p2362_p1) target bundleno = 1201 (0x4b1), region = 36  ;;  %s1375_s17 = sshll.u32 (!%p2362_p1), %s1927_s0, 4 }
  0x73   : > { %s251_s29 = scalar_lea.sflag (!%p2362_p1), [#allocation3], %s1927_s0  ;;  %s254_s10 = scalar_lea.vmem (!%p2362_p1), [#allocation2], %s1375_s17 }
  0x79   : > { %1673 = dma.done.wait (%p2363_p2), %s251_s29, 256  }
  0x7a   : > { %1675 = vsyncadd (%p2363_p2), %s251_s29, 4294967040  ;;  %s259_s8 = sand.u32 1, %s1772_s21   ;;  %s1937_s25 = sshll.u32 %s1927_s0, 3 }
  0x7b   : > { %s260_s26 = scalar_lea.sflag [#allocation6], %s259_s8  ;;  %s263_s23 = scalar_lea.vmem [#allocation5], %s1937_s25 }
  0x7c   : > { %1677 = dma.done.wait (%p2363_p2), %s260_s26, 256  }
  0x7d   : > { %1679 = vsyncadd (%p2363_p2), %s260_s26, 4294967040  ;;  %v315_v0 = vlaneseq  ;;  %v1713_v1 = vmov 1966171168   ;;  %v307_v10 = vld [vmem:[%s263_s23] sm:$0xff]  ;;  %v1958_v18 = vld [vmem:[%s254_s10 + $0x8] sm:$0xff]  ;;  %s272_s14 = scalar_lea.vmem [#allocation7], %s1937_s25 }
  0x7e   : > { %v313_v2 = vunpack.c.l.s4 %v1713_v1  ;;  %v311_v13 = vcombine.high %v307_v10, %v307_v10  ;;  %v1956_v17 = vld [vmem:[%s254_s10] sm:$0xff]  ;;  %vm700_vm0 = vcmask 130112   ;;  %vm765_vm1 = vcmask 1041409   ;;  %s1381_s9 = sshll.u32 %s1698_s18, 7  ;;  %s306_s22 = scalar_lea.vmem [#allocation8], %s1937_s25 }
  0x7f   : > { %v1944_v3 = vshrl.u32 %v315_v0, 7  ;;  %v690_v4 = vand.u32 127, %v315_v0  ;;  %v1976_v38 = vld [vmem:[%s2335_s2] ss:$0 sm:$0xff]  ;;  %vm767_vm2 = vcmask 1042434   ;;  %vm769_vm3 = vcmask 1043459   ;;  %s2282_s19 = scalar_lea.hbm %s2337_s4, %s1381_s9 }
  0x80   : > { %v314_v5 = vunpack.c.0.s8 %v313_v2  ;;  %vm771_vm4 = vcmask 1044484   ;;  %vm773_vm5 = vcmask 1045509   ;;  %vm775_vm6 = vcmask 1046534   ;;  %s1239_s6 = sshll.u32 %s306_s22, 4  ;;  %s1225_s18 = scalar_lea.sflag [#allocation4], %s1927_s0  ;;  %s2284_s6 = int_to_ptr.vmem [resolvable:$true] %s1239_s6 }
  0x81   : > { %v1947_v6 = vsub.s32 %v690_v4, %v1944_v3  ;;  %v695_v7 = vadd.s32 4294967288, %v690_v4  ;;  %v1954_v12 = vsub.s32 0, %v1944_v3  ;;  %vm777_vm7 = vcmask 1047559   ;;  %s1620_s11 = scalar_lea.vmem %s2284_s6, 128  ;;  %p2364_p6 = scmp.ne.s32.totalorder %s2352_s28, 0 }
  0x82   : > { %v317_v8 = vsub.s32 %v314_v5, %v1944_v3  ;;  %vm780_vm8 = vcmask 130048   ;;  %p1621_p0 = scmp.ne.s32.totalorder %s2284_s6, %s1620_s11  ;;  %s1715_s5 = smov [#allocation8]  }
  0x83   : > { %v1951_v9 = vsub.s32 %v695_v7, %v1944_v3  ;;  %s1624_s24 = sshll.u32 %s1715_s5, 4  ;;  %s1625_s24 = int_to_ptr.vmem [resolvable:$false] %s1624_s24 }
  0x84   : > { %v318_v11 = vrot.slane %v307_v10, %v317_v8  ;;  %v325_v16 = vrot.slane %v311_v13, %v317_v8  ;;  %p1622_p12 = pnand %p1621_p0, %p2364_p6  ;;  %s1626_s13 = scalar_lea.vmem %s1625_s24, 256 }
  0x85   : > { %p1627_p8 = scmp.lt.s32.totalorder %s2284_s6, %s1625_s24  ;;  %p1628_p9 = scmp.lt.s32.totalorder %s1626_s13, %s1620_s11 }
  0x86   : > { %v334_v14 = vrot.slane %v318_v11, %v317_v8  ;;  %v326_v15 = vcombine.high %v318_v11, %v318_v11  ;;  %v341_v22 = vrot.slane %v325_v16, %v317_v8  ;;  %v327_v29 = vcombine.high %v325_v16, %v325_v16  ;;  %p1623_p4 = pneg %p1622_p12 }
  0x87   : > { %p1629_p10 = por %p1628_p9, %p1627_p8 }
  0x88   : > { %v363_v19 = vrot.slane %v334_v14, %v1954_v12  ;;  %v348_v20 = vrot.slane %v326_v15, %v317_v8  ;;  %v356_v21 = vcombine.high %v334_v14, %v334_v14  ;;  %v379_v27 = vrot.slane %v341_v22, %v1954_v12 }
  0x89   : > { %v355_v36 = vrot.slane %v327_v29, %v317_v8  ;;  %v357_v41 = vcombine.high %v341_v22, %v341_v22  ;;  %v1714_v29 = vmov 0   ;;  %p1630_p13 = pnand %p1629_p10, %p1623_p4 }
  0x8a   : > { %v400_v23 = vadd.f32 %v363_v19, %v1956_v17  ;;  %v367_v24 = vrot.slane %v348_v20, %v1954_v12  ;;  %v401_v25 = vadd.f32 %v363_v19, %v1958_v18  ;;  %v371_v26 = vrot.slane %v356_v21, %v1954_v12  ;;  %1461 = vset.pattern.permute.xlu0 %v1714_v29 }
  0x8b   : > { %v358_v28 = vcombine.high %v348_v20, %v348_v20  ;;  %v408_v34 = vadd.f32 %v379_v27, %v1956_v17  ;;  %v409_v37 = vadd.f32 %v379_v27, %v1958_v18  ;;  %v383_v40 = vrot.slane %v355_v36, %v1954_v12  ;;  %1462 = vset.pattern.permute.xlu1 %v1714_v29 }
  0x8c   : > { %1464 = vtanh.f32 %v400_v23  ;;  %v402_v30 = vadd.f32 %v367_v24, %v1956_v17  ;;  %v403_v31 = vadd.f32 %v367_v24, %v1958_v18  ;;  %v404_v32 = vadd.f32 %v371_v26, %v1956_v17  ;;  %v503_v24 = vld [vmem:[%s272_s14] sm:$0xff] }
  0x8d   : > { %1466 = vtanh.f32 %v401_v25  ;;  %v405_v33 = vadd.f32 %v371_v26, %v1958_v18  ;;  %v375_v35 = vrot.slane %v358_v28, %v1954_v12  ;;  %v410_v47 = vadd.f32 %v383_v40, %v1956_v17 }
  0x8e   : > { %1468 = vtanh.f32 %v402_v30  ;;  %v387_v48 = vrot.slane %v357_v41, %v1954_v12  ;;  %v359_v49 = vcombine.high %v355_v36, %v355_v36  ;;  %v411_v54 = vadd.f32 %v383_v40, %v1958_v18 }
  0x8f   : > { %1470 = vtanh.f32 %v403_v31  ;;  %v406_v39 = vadd.f32 %v375_v35, %v1956_v17  ;;  %v407_v43 = vadd.f32 %v375_v35, %v1958_v18  ;;  %v2007_v25 = vsub.s32 1, %v1944_v3 }
  0x90   : > { %1472 = vtanh.f32 %v404_v32  ;;  %v412_v57 = vadd.f32 %v387_v48, %v1956_v17  ;;  %v391_v58 = vrot.slane %v359_v49, %v1954_v12  ;;  %v413_v61 = vadd.f32 %v387_v48, %v1958_v18 }
  0x91   : > { %1474 = vtanh.f32 %v405_v33  ;;  %v508_v26 = vrot.slane %v503_v24, %v1954_v12  ;;  %v2011_v27 = vsub.s32 2, %v1944_v3  ;;  %v519_v28 = vrot.slane %v503_v24, %v2007_v25 }
  0x92   : > { %1476 = vtanh.f32 %v408_v34  ;;  %v414_v0 = vadd.f32 %v391_v58, %v1956_v17  ;;  %v415_v4 = vadd.f32 %v391_v58, %v1958_v18  ;;  %v2016_v31 = vsub.s32 3, %v1944_v3 }
  0x93   : > { %1478 = vtanh.f32 %v409_v37  ;;  %v530_v30 = vrot.slane %v503_v24, %v2011_v27  ;;  %v2020_v33 = vsub.s32 4, %v1944_v3  ;;  %v2024_v35 = vsub.s32 5, %v1944_v3 }
  0x94   : > { %1480 = vtanh.f32 %v406_v39  ;;  %v541_v32 = vrot.slane %v503_v24, %v2016_v31  ;;  %v2028_v37 = vsub.s32 6, %v1944_v3  ;;  %v2032_v39 = vsub.s32 7, %v1944_v3 }
  0x95   : > { %1482 = vtanh.f32 %v407_v43  ;;  %v552_v34 = vrot.slane %v503_v24, %v2020_v33  ;;  %v563_v36 = vrot.slane %v503_v24, %v2024_v35 }
  0x96   : > { %v1465_v42 = vpop.eup %1464  ;;  %1484 = vtanh.f32 %v410_v47  ;;  %v585_v40 = vrot.slane %v503_v24, %v2032_v39 }
  0x97   : > { %v1467_v44 = vpop.eup %1466  ;;  %v439_v45 = vmul.f32 %v1465_v42, %v1976_v38  ;;  %1486 = vtanh.f32 %v411_v54 }
  0x98   : > { %v1469_v46 = vpop.eup %1468  ;;  %v440_v52 = vmul.f32 %v1467_v44, %v1976_v38  ;;  %1488 = vtanh.f32 %v412_v57 }
  0x99   : > { %v1471_v50 = vpop.eup %1470  ;;  %455 = vadd.xlane.f32.xlu0 %v439_v45  ;;  %v441_v51 = vmul.f32 %v1469_v46, %v1976_v38  ;;  %1490 = vtanh.f32 %v413_v61 }
  0x9a   : > { %v1473_v53 = vpop.eup %1472  ;;  %v442_v55 = vmul.f32 %v1471_v50, %v1976_v38  ;;  %1492 = vtanh.f32 %v414_v0 }
  0x9b   : > { %459 = vadd.xlane.f32.xlu1 %v441_v51  ;;  %v1475_v56 = vpop.eup %1474  ;;  %v443_v59 = vmul.f32 %v1473_v53, %v1976_v38  ;;  %1494 = vtanh.f32 %v415_v4 }
  0x9c   : > { %v1477_v60 = vpop.eup %1476  ;;  %v444_v62 = vmul.f32 %v1475_v56, %v1976_v38 }
  0x9d   : > { %457 = vadd.xlane.f32.xlu0 %v440_v52  ;;  %v1479_v63 = vpop.eup %1478  ;;  %v447_v1 = vmul.f32 %v1477_v60, %v1976_v38 }
  0x9e   : > { %v1481_v2 = vpop.eup %1480  ;;  %v448_v5 = vmul.f32 %v1479_v63, %v1976_v38 }
  0x9f   : > { %461 = vadd.xlane.f32.xlu1 %v442_v55  ;;  %v1483_v7 = vpop.eup %1482  ;;  %v445_v8 = vmul.f32 %v1481_v2, %v1976_v38 }
  0xa0   : > { %v1485_v10 = vpop.eup %1484  ;;  %v446_v11 = vmul.f32 %v1483_v7, %v1976_v38 }
  0xa1   : > { %463 = vadd.xlane.f32.xlu0 %v443_v59  ;;  %v1487_v13 = vpop.eup %1486  ;;  %v449_v14 = vmul.f32 %v1485_v10, %v1976_v38 }
  0xa2   : > { %v1489_v15 = vpop.eup %1488  ;;  %v450_v16 = vmul.f32 %v1487_v13, %v1976_v38 }
  0xa3   : > { %465 = vadd.xlane.f32.xlu1 %v444_v62  ;;  %v1491_v17 = vpop.eup %1490  ;;  %v451_v18 = vmul.f32 %v1489_v15, %v1976_v38 }
  0xa4   : > { %v1493_v19 = vpop.eup %1492  ;;  %v452_v20 = vmul.f32 %v1491_v17, %v1976_v38 }
  0xa5   : > { %471 = vadd.xlane.f32.xlu0 %v447_v1  ;;  %v1495_v21 = vpop.eup %1494  ;;  %v453_v22 = vmul.f32 %v1493_v19, %v1976_v38 }
  0xa6   : > { %v454_v23 = vmul.f32 %v1495_v21, %v1976_v38  ;;  %v574_v38 = vrot.slane %v503_v24, %v2028_v37 }
  0xa7   : > { %473 = vadd.xlane.f32.xlu1 %v448_v5 }
  0xa9   : > { %467 = vadd.xlane.f32.xlu0 %v445_v8 }
  0xab   : > { %469 = vadd.xlane.f32.xlu1 %v446_v11 }
  0xad   : > { %475 = vadd.xlane.f32.xlu0 %v449_v14 }
  0xaf   : > { %477 = vadd.xlane.f32.xlu1 %v450_v16 }
  0xb1   : > { %479 = vadd.xlane.f32.xlu0 %v451_v18 }
  0xb3   : > { %481 = vadd.xlane.f32.xlu1 %v452_v20 }
  0xb5   : > { %483 = vadd.xlane.f32.xlu0 %v453_v22 }
  0xb7   : > { %485 = vadd.xlane.f32.xlu1 %v454_v23 }
  0xc8   : > { %514 = vbcast.lane.b32.xlu1 %v508_v26, 264 }
  0xcb   : > { %510 = vbcast.lane.b32.xlu0 %v508_v26, 256 }
  0xcc   : > { %521 = vbcast.lane.b32.xlu1 %v519_v28, 256 }
  0xcf   : > { %532 = vbcast.lane.b32.xlu0 %v530_v30, 256 }
  0xd0   : > { %525 = vbcast.lane.b32.xlu1 %v519_v28, 264 }
  0xd3   : > { %543 = vbcast.lane.b32.xlu0 %v541_v32, 256 }
  0xd4   : > { %536 = vbcast.lane.b32.xlu1 %v530_v30, 264 }
  0xd7   : > { %554 = vbcast.lane.b32.xlu0 %v552_v34, 256 }
  0xd8   : > { %547 = vbcast.lane.b32.xlu1 %v541_v32, 264 }
  0xdb   : > { %565 = vbcast.lane.b32.xlu0 %v563_v36, 256 }
  0xdc   : > { %558 = vbcast.lane.b32.xlu1 %v552_v34, 264 }
  0xdf   : > { %576 = vbcast.lane.b32.xlu0 %v574_v38, 256 }
  0xe0   : > { %569 = vbcast.lane.b32.xlu1 %v563_v36, 264 }
  0xe3   : > { %587 = vbcast.lane.b32.xlu0 %v585_v40, 256 }
  0xe4   : > { %580 = vbcast.lane.b32.xlu1 %v574_v38, 264 }
  0xe8   : > { %591 = vbcast.lane.b32.xlu1 %v585_v40, 264 }
 0x126   : > { %v456_v41 = vpop.xlane.xlu0 %455 }
 0x128   : > { %v460_v42 = vpop.xlane.xlu1 %459 }
 0x12a   : > { %v458_v43 = vpop.xlane.xlu0 %457 }
 0x12c   : > { %v462_v44 = vpop.xlane.xlu1 %461 }
 0x12e   : > { %v464_v45 = vpop.xlane.xlu0 %463 }
 0x130   : > { %v466_v46 = vpop.xlane.xlu1 %465 }
 0x132   : > { %v472_v47 = vpop.xlane.xlu0 %471 }
 0x134   : > { %v474_v48 = vpop.xlane.xlu1 %473 }
 0x136   : > { %v468_v49 = vpop.xlane.xlu0 %467 }
 0x138   : > { %v470_v50 = vpop.xlane.xlu1 %469 }
 0x13a   : > { %v476_v3 = vpop.xlane.xlu0 %475 }
 0x13c   : > { %v478_v51 = vpop.xlane.xlu1 %477 }
 0x13e   : > { %v480_v52 = vpop.xlane.xlu0 %479 }
 0x140   : > { %v482_v53 = vpop.xlane.xlu1 %481 }
 0x142   : > { %v484_v54 = vpop.xlane.xlu0 %483 }
 0x144   : > { %v486_v55 = vpop.xlane.xlu1 %485 }
 0x146   : > { %v511_v56 = vpop.permute.xlu0 %510 }
 0x147   : > { %v2035_v57 = vadd.f32 %v511_v56, %v456_v41 }
 0x148   : > { %v515_v58 = vpop.permute.xlu1 %514 }
 0x149   : > { %v2037_v59 = vadd.f32 %v515_v58, %v458_v43  ;;  %642 = vperm.xlu0 %1461, %v2035_v57  }
 0x14a   : > { %v533_v60 = vpop.permute.xlu0 %532 }
 0x14b   : > { %645 = vperm.xlu1 %1462, %v2037_v59   ;;  %v2044_v1 = vadd.f32 %v533_v60, %v464_v45 }
 0x14c   : > { %v522_v61 = vpop.permute.xlu1 %521 }
 0x14d   : > { %v2041_v62 = vadd.f32 %v522_v61, %v460_v42 }
 0x14e   : > { %v544_v63 = vpop.permute.xlu0 %543 }
 0x14f   : > { %648 = vperm.xlu1 %1462, %v2041_v62   ;;  %v2056_v13 = vadd.f32 %v544_v63, %v468_v49 }
 0x150   : > { %v526_v0 = vpop.permute.xlu1 %525 }
 0x151   : > { %v2046_v2 = vadd.f32 %v526_v0, %v462_v44 }
 0x152   : > { %v555_v4 = vpop.permute.xlu0 %554 }
 0x153   : > { %651 = vperm.xlu0 %1461, %v2046_v2   ;;  %654 = vperm.xlu1 %1462, %v2044_v1   ;;  %v2050_v7 = vadd.f32 %v555_v4, %v472_v47 }
 0x154   : > { %v537_v5 = vpop.permute.xlu1 %536 }
 0x155   : > { %v2052_v8 = vadd.f32 %v537_v5, %v466_v46 }
 0x156   : > { %v566_v10 = vpop.permute.xlu0 %565 }
 0x157   : > { %657 = vperm.xlu0 %1461, %v2052_v8   ;;  %666 = vperm.xlu1 %1462, %v2050_v7   ;;  %v2059_v16 = vadd.f32 %v566_v10, %v476_v3 }
 0x158   : > { %v548_v11 = vpop.permute.xlu1 %547 }
 0x159   : > { %v2065_v19 = vadd.f32 %v548_v11, %v470_v50 }
 0x15a   : > { %v577_v14 = vpop.permute.xlu0 %576 }
 0x15b   : > { %660 = vperm.xlu1 %1462, %v2056_v13   ;;  %v2067_v20 = vadd.f32 %v577_v14, %v480_v52 }
 0x15c   : > { %v559_v15 = vpop.permute.xlu1 %558 }
 0x15d   : > { %v2061_v17 = vadd.f32 %v559_v15, %v474_v48 }
 0x15e   : > { %v588_v21 = vpop.permute.xlu0 %587 }
 0x15f   : > { %669 = vperm.xlu0 %1461, %v2061_v17   ;;  %672 = vperm.xlu1 %1462, %v2059_v16   ;;  %v2071_v23 = vadd.f32 %v588_v21, %v484_v54 }
 0x160   : > { %v570_v18 = vpop.permute.xlu1 %569 }
 0x161   : > { %v2073_v24 = vadd.f32 %v570_v18, %v478_v51 }
 0x163   : > { %663 = vperm.xlu0 %1461, %v2065_v19   ;;  %678 = vperm.xlu1 %1462, %v2067_v20  }
 0x164   : > { %v581_v22 = vpop.permute.xlu1 %580 }
 0x165   : > { %v2077_v26 = vadd.f32 %v581_v22, %v482_v53 }
 0x167   : > { %675 = vperm.xlu0 %1461, %v2073_v24   ;;  %684 = vperm.xlu1 %1462, %v2071_v23  }
 0x168   : > { %v592_v28 = vpop.permute.xlu1 %591 }
 0x169   : > { %v2080_v29 = vadd.f32 %v592_v28, %v486_v55 }
 0x16b   : > { %681 = vperm.xlu0 %1461, %v2077_v26  }
 0x16f   : > { %687 = vperm.xlu0 %1461, %v2080_v29  }
 0x1c8   : > { %v643_v34 = vpop.permute.xlu0 %642 }
 0x1c9   : > { %v694_v53 = vrot.slane %v643_v34, %v1947_v6 }
 0x1ca   : > { %v646_v30 = vpop.permute.xlu1 %645 }
 0x1cb   : > { %v699_v48 = vrot.slane %v646_v30, %v1951_v9 }
 0x1cd   : > { %v701_v58 = vsel %vm700_vm0, %v699_v48, %v694_v53 }
 0x1ce   : > { %v649_v32 = vpop.permute.xlu1 %648 }
 0x1cf   : > { %v705_v49 = vrot.slane %v649_v32, %v1947_v6 }
 0x1d2   : > { %v655_v36 = vpop.permute.xlu1 %654  ;;  %v652_v38 = vpop.permute.xlu0 %651 }
 0x1d3   : > { %v709_v46 = vrot.slane %v652_v38, %v1951_v9  ;;  %v714_v3 = vrot.slane %v655_v36, %v1947_v6 }
 0x1d5   : > { %v710_v54 = vsel %vm700_vm0, %v709_v46, %v705_v49 }
 0x1d6   : > { %v667_v40 = vpop.permute.xlu1 %666  ;;  %v658_v41 = vpop.permute.xlu0 %657  ;;  %v766_v63 = vsel %vm765_vm1, %v710_v54, %v701_v58 }
 0x1d7   : > { %v718_v47 = vrot.slane %v658_v41, %v1951_v9  ;;  %v732_v14 = vrot.slane %v667_v40, %v1947_v6 }
 0x1d9   : > { %v719_v56 = vsel %vm700_vm0, %v718_v47, %v714_v3 }
 0x1da   : > { %v661_v42 = vpop.permute.xlu1 %660  ;;  %v768_v5 = vsel %vm767_vm2, %v719_v56, %v766_v63 }
 0x1db   : > { %v723_v55 = vrot.slane %v661_v42, %v1947_v6 }
 0x1de   : > { %v670_v43 = vpop.permute.xlu0 %669  ;;  %v673_v44 = vpop.permute.xlu1 %672 }
 0x1df   : > { %v736_v0 = vrot.slane %v670_v43, %v1951_v9  ;;  %v741_v10 = vrot.slane %v673_v44, %v1947_v6 }
 0x1e1   : > { %v737_v28 = vsel %vm700_vm0, %v736_v0, %v732_v14 }
 0x1e2   : > { %v664_v45 = vpop.permute.xlu0 %663  ;;  %v679_v51 = vpop.permute.xlu1 %678 }
 0x1e3   : > { %v727_v50 = vrot.slane %v664_v45, %v1951_v9  ;;  %v750_v15 = vrot.slane %v679_v51, %v1947_v6 }
 0x1e5   : > { %v728_v60 = vsel %vm700_vm0, %v727_v50, %v723_v55 }
 0x1e6   : > { %v676_v52 = vpop.permute.xlu0 %675  ;;  %v770_v18 = vsel %vm769_vm3, %v728_v60, %v768_v5  ;;  %v685_v21 = vpop.permute.xlu1 %684 }
 0x1e7   : > { %v745_v61 = vrot.slane %v676_v52, %v1951_v9  ;;  %v759_v34 = vrot.slane %v685_v21, %v1947_v6  ;;  %v772_v38 = vsel %vm771_vm4, %v737_v28, %v770_v18 }
 0x1e9   : > { %v746_v22 = vsel %vm700_vm0, %v745_v61, %v741_v10 }
 0x1ea   : > { %v682_v4 = vpop.permute.xlu0 %681  ;;  %v774_v40 = vsel %vm773_vm5, %v746_v22, %v772_v38 }
 0x1eb   : > { %v754_v11 = vrot.slane %v682_v4, %v1951_v9 }
 0x1ed   : > { %v755_v30 = vsel %vm700_vm0, %v754_v11, %v750_v15 }
 0x1ee   : > { %v688_v32 = vpop.permute.xlu0 %687  ;;  %v776_v42 = vsel %vm775_vm6, %v755_v30, %v774_v40 }
 0x1ef   : > { %v763_v36 = vrot.slane %v688_v32, %v1951_v9 }
 0x1f1   : > { %v764_v41 = vsel %vm700_vm0, %v763_v36, %v759_v34 }
 0x1f2   : > { %v778_v43 = vsel %vm777_vm7, %v764_v41, %v776_v42 }
 0x1f3   : > { %v781_v44 = vsel %vm780_vm8, %v778_v43, -inf }
 0x1f4   : > { %782 = vmax.xlane.f32.xlu1 %v781_v44 }
 0x281   : > { %v783_v45 = vpop.xlane.xlu1 %782 }
 0x282   : > { %v788_v46 = vrot.slane %v783_v45, %v1954_v12  ;;  %v804_v47 = vrot.slane %v783_v45, %v2020_v33  ;;  %v2121_v49 = vrot.slane %v783_v45, %v2032_v39  ;;  %v792_v50 = vrot.slane %v783_v45, %v2007_v25 }
 0x283   : > { %v800_v61 = vrot.slane %v783_v45, %v2016_v31  ;;  %v808_v18 = vrot.slane %v783_v45, %v2024_v35  ;;  %v812_v32 = vrot.slane %v783_v45, %v2028_v37 }
 0x284   : > { %v2118_v48 = vsub.f32 %v2035_v57, %v788_v46  ;;  %v2125_v3 = vsub.f32 %v2037_v59, %v788_v46  ;;  %v2128_v51 = vsub.f32 %v2061_v17, %v804_v47  ;;  %v2133_v53 = vsub.f32 %v2080_v29, %v2121_v49 }
 0x285   : > { %v2136_v57 = vsub.f32 %v2041_v62, %v792_v50  ;;  %v796_v17 = vrot.slane %v783_v45, %v2011_v27  ;;  %v2143_v56 = vsub.f32 %v2046_v2, %v792_v50  ;;  %v2169_v28 = vsub.f32 %v2059_v16, %v808_v18 }
 0x286   : > { %v841_v52 = vmul.f32 1.442695, %v2118_v48  ;;  %v843_v54 = vmul.f32 1.442695, %v2125_v3  ;;  %v859_v55 = vmul.f32 1.442695, %v2128_v51  ;;  %v2174_v34 = vsub.f32 %v2073_v24, %v808_v18 }
 0x287   : > { %v871_v59 = vmul.f32 1.442695, %v2133_v53  ;;  %v845_v58 = vmul.f32 1.442695, %v2136_v57  ;;  %v2147_v62 = vsub.f32 %v2044_v1, %v796_v17  ;;  %v847_v29 = vmul.f32 1.442695, %v2143_v56 }
 0x288   : > { %1496 = vpow2.f32 %v841_v52  ;;  %v2152_v63 = vsub.f32 %v2052_v8, %v796_v17  ;;  %v2156_v1 = vsub.f32 %v2056_v13, %v800_v61  ;;  %v2160_v8 = vsub.f32 %v2065_v19, %v800_v61 }
 0x289   : > { %1498 = vpow2.f32 %v859_v55  ;;  %v849_v2 = vmul.f32 1.442695, %v2147_v62  ;;  %v2165_v13 = vsub.f32 %v2050_v7, %v804_v47  ;;  %v861_v7 = vmul.f32 1.442695, %v2169_v28 }
 0x28a   : > { %1500 = vpow2.f32 %v843_v54  ;;  %v851_v5 = vmul.f32 1.442695, %v2152_v63  ;;  %v853_v14 = vmul.f32 1.442695, %v2156_v1  ;;  %v855_v21 = vmul.f32 1.442695, %v2160_v8 }
 0x28b   : > { %1502 = vpow2.f32 %v871_v59  ;;  %v857_v19 = vmul.f32 1.442695, %v2165_v13  ;;  %v2178_v38 = vsub.f32 %v2067_v20, %v812_v32  ;;  %v863_v16 = vmul.f32 1.442695, %v2174_v34 }
 0x28c   : > { %1504 = vpow2.f32 %v845_v58  ;;  %v2182_v41 = vsub.f32 %v2077_v26, %v812_v32  ;;  %v2187_v43 = vsub.f32 %v2071_v23, %v2121_v49 }
 0x28d   : > { %1506 = vpow2.f32 %v847_v29  ;;  %v865_v42 = vmul.f32 1.442695, %v2178_v38 }
 0x28e   : > { %1508 = vpow2.f32 %v849_v2  ;;  %v867_v20 = vmul.f32 1.442695, %v2182_v41  ;;  %v869_v45 = vmul.f32 1.442695, %v2187_v43 }
 0x28f   : > { %1510 = vpow2.f32 %v851_v5 }
 0x290   : > { %1512 = vpow2.f32 %v853_v14 }
 0x291   : > { %1514 = vpow2.f32 %v855_v21 }
 0x292   : > { %v1497_v60 = vpop.eup %1496  ;;  %1516 = vpow2.f32 %v857_v19 }
 0x293   : > { %890 = vperm.xlu0 %1461, %v1497_v60   ;;  %v1499_v0 = vpop.eup %1498  ;;  %1518 = vpow2.f32 %v861_v7 }
 0x294   : > { %v1501_v4 = vpop.eup %1500  ;;  %917 = vperm.xlu1 %1462, %v1499_v0   ;;  %1520 = vpow2.f32 %v863_v16 }
 0x295   : > { %v1503_v10 = vpop.eup %1502  ;;  %1522 = vpow2.f32 %v865_v42 }
 0x296   : > { %v1505_v11 = vpop.eup %1504  ;;  %1524 = vpow2.f32 %v867_v20 }
 0x297   : > { %893 = vperm.xlu0 %1461, %v1501_v4   ;;  %v1507_v15 = vpop.eup %1506  ;;  %1526 = vpow2.f32 %v869_v45 }
 0x298   : > { %935 = vperm.xlu1 %1462, %v1503_v10   ;;  %v1509_v22 = vpop.eup %1508 }
 0x299   : > { %v1511_v30 = vpop.eup %1510 }
 0x29a   : > { %v1513_v36 = vpop.eup %1512 }
 0x29b   : > { %896 = vperm.xlu0 %1461, %v1505_v11   ;;  %v1515_v40 = vpop.eup %1514 }
 0x29c   : > { %v1517_v24 = vpop.eup %1516 }
 0x29d   : > { %v1519_v44 = vpop.eup %1518 }
 0x29e   : > { %v1521_v46 = vpop.eup %1520 }
 0x29f   : > { %899 = vperm.xlu0 %1461, %v1507_v15   ;;  %v1523_v26 = vpop.eup %1522 }
 0x2a0   : > { %v1525_v47 = vpop.eup %1524 }
 0x2a1   : > { %v1527_v50 = vpop.eup %1526 }
 0x2a3   : > { %902 = vperm.xlu0 %1461, %v1509_v22  }
 0x2a7   : > { %905 = vperm.xlu0 %1461, %v1511_v30  }
 0x2ab   : > { %908 = vperm.xlu0 %1461, %v1513_v36  }
 0x2af   : > { %911 = vperm.xlu0 %1461, %v1515_v40  }
 0x2b3   : > { %914 = vperm.xlu0 %1461, %v1517_v24  }
 0x2b7   : > { %920 = vperm.xlu0 %1461, %v1519_v44  }
 0x2bb   : > { %923 = vperm.xlu0 %1461, %v1521_v46  }
 0x2bf   : > { %926 = vperm.xlu0 %1461, %v1523_v26  }
 0x2c3   : > { %929 = vperm.xlu0 %1461, %v1525_v47  }
 0x2c7   : > { %932 = vperm.xlu0 %1461, %v1527_v50  }
 0x312   : > { %v891_v52 = vpop.permute.xlu0 %890 }
 0x313   : > { %v918_v0 = vpop.permute.xlu1 %917  ;;  %v940_v21 = vrot.slane %v891_v52, %v1947_v6 }
 0x314   : > { %v980_v32 = vrot.slane %v918_v0, %v1951_v9 }
 0x316   : > { %v894_v23 = vpop.permute.xlu0 %893 }
 0x317   : > { %v944_v10 = vrot.slane %v894_v23, %v1951_v9  ;;  %v936_v20 = vpop.permute.xlu1 %935 }
 0x319   : > { %v945_v16 = vsel %vm700_vm0, %v944_v10, %v940_v21 }
 0x31a   : > { %v897_v49 = vpop.permute.xlu0 %896 }
 0x31b   : > { %v949_v11 = vrot.slane %v897_v49, %v1947_v6  ;;  %v1007_v49 = vrot.slane %v936_v20, %v1951_v9 }
 0x31e   : > { %v900_v54 = vpop.permute.xlu0 %899 }
 0x31f   : > { %v953_v2 = vrot.slane %v900_v54, %v1951_v9 }
 0x321   : > { %v954_v22 = vsel %vm700_vm0, %v953_v2, %v949_v11 }
 0x322   : > { %v903_v55 = vpop.permute.xlu0 %902  ;;  %v1009_v44 = vsel %vm765_vm1, %v954_v22, %v945_v16 }
 0x323   : > { %v958_v15 = vrot.slane %v903_v55, %v1947_v6 }
 0x326   : > { %v906_v59 = vpop.permute.xlu0 %905 }
 0x327   : > { %v962_v4 = vrot.slane %v906_v59, %v1951_v9 }
 0x329   : > { %v963_v7 = vsel %vm700_vm0, %v962_v4, %v958_v15 }
 0x32a   : > { %v909_v17 = vpop.permute.xlu0 %908  ;;  %v1010_v26 = vsel %vm767_vm2, %v963_v7, %v1009_v44 }
 0x32b   : > { %v967_v19 = vrot.slane %v909_v17, %v1947_v6 }
 0x32e   : > { %v912_v58 = vpop.permute.xlu0 %911 }
 0x32f   : > { %v971_v14 = vrot.slane %v912_v58, %v1951_v9 }
 0x331   : > { %v972_v40 = vsel %vm700_vm0, %v971_v14, %v967_v19 }
 0x332   : > { %v915_v29 = vpop.permute.xlu0 %914  ;;  %v1011_v50 = vsel %vm769_vm3, %v972_v40, %v1010_v26 }
 0x333   : > { %v976_v18 = vrot.slane %v915_v29, %v1947_v6 }
 0x335   : > { %v981_v45 = vsel %vm700_vm0, %v980_v32, %v976_v18 }
 0x336   : > { %v921_v60 = vpop.permute.xlu0 %920  ;;  %v1012_v54 = vsel %vm771_vm4, %v981_v45, %v1011_v50 }
 0x337   : > { %v985_v42 = vrot.slane %v921_v60, %v1947_v6 }
 0x33a   : > { %v924_v61 = vpop.permute.xlu0 %923 }
 0x33b   : > { %v989_v30 = vrot.slane %v924_v61, %v1951_v9 }
 0x33d   : > { %v990_v47 = vsel %vm700_vm0, %v989_v30, %v985_v42 }
 0x33e   : > { %v927_v5 = vpop.permute.xlu0 %926  ;;  %v1013_v59 = vsel %vm773_vm5, %v990_v47, %v1012_v54 }
 0x33f   : > { %v994_v46 = vrot.slane %v927_v5, %v1947_v6 }
 0x342   : > { %v930_v36 = vpop.permute.xlu0 %929 }
 0x343   : > { %v998_v24 = vrot.slane %v930_v36, %v1951_v9 }
 0x345   : > { %v999_v52 = vsel %vm700_vm0, %v998_v24, %v994_v46 }
 0x346   : > { %v933_v23 = vpop.permute.xlu0 %932  ;;  %v1014_v58 = vsel %vm775_vm6, %v999_v52, %v1013_v59 }
 0x347   : > { %v1003_v55 = vrot.slane %v933_v23, %v1947_v6 }
 0x349   : > { %v1008_v17 = vsel %vm700_vm0, %v1007_v49, %v1003_v55 }
 0x34a   : > { %v1015_v29 = vsel %vm777_vm7, %v1008_v17, %v1014_v58 }
 0x34b   : > { %v1017_v60 = vsel %vm780_vm8, %v1015_v29, 0.0 }
 0x34c   : > { %1018 = vadd.xlane.f32.xlu0 %v1017_v60 }
 0x3d9   : > { %v1019_v61 = vpop.xlane.xlu0 %1018 }
 0x3da   : > { %1528 = vlog2.f32 %v1019_v61 }
 0x3e4   : > { %v1529_v2 = vpop.eup %1528 }
 0x3e5   : > { %v1021_v0 = vmul.f32 0.6931472, %v1529_v2 }
 0x3e7   : > { %v1042_v4 = vrot.slane %v1021_v0, %v2020_v33  ;;  %v1026_v5 = vrot.slane %v1021_v0, %v1954_v12  ;;  %v1054_v14 = vrot.slane %v1021_v0, %v2032_v39  ;;  %v1030_v21 = vrot.slane %v1021_v0, %v2007_v25 }
 0x3e9   : > { %v1071_v10 = vsub.f32 %v2165_v13, %v1042_v4  ;;  %v1063_v11 = vsub.f32 %v2118_v48, %v1026_v5  ;;  %v1078_v15 = vsub.f32 %v2133_v53, %v1054_v14  ;;  %v1064_v18 = vsub.f32 %v2125_v3, %v1026_v5 }
 0x3ea   : > { %v1065_v33 = vsub.f32 %v2136_v57, %v1030_v21  ;;  %v1066_v12 = vsub.f32 %v2143_v56, %v1030_v21  ;;  %v1034_v13 = vrot.slane %v1021_v0, %v2011_v27  ;;  %v1038_v53 = vrot.slane %v1021_v0, %v2016_v31 }
 0x3eb   : > { %1120 = vperm.xlu0 %1461, %v1071_v10   ;;  %1096 = vperm.xlu1 %1462, %v1063_v11   ;;  %v1072_v57 = vsub.f32 %v2128_v51, %v1042_v4  ;;  %v1046_v56 = vrot.slane %v1021_v0, %v2024_v35 }
 0x3ec   : > { %v1067_v39 = vsub.f32 %v2147_v62, %v1034_v13  ;;  %v1068_v48 = vsub.f32 %v2152_v63, %v1034_v13  ;;  %v1069_v25 = vsub.f32 %v2156_v1, %v1038_v53  ;;  %v1070_v3 = vsub.f32 %v2160_v8, %v1038_v53 }
 0x3ed   : > { %v1073_v27 = vsub.f32 %v2169_v28, %v1046_v56  ;;  %v1074_v62 = vsub.f32 %v2174_v34, %v1046_v56  ;;  %v1050_v63 = vrot.slane %v1021_v0, %v2028_v37  ;;  %v1077_v8 = vsub.f32 %v2187_v43, %v1054_v14 }
 0x3ef   : > { %1141 = vperm.xlu0 %1461, %v1078_v15   ;;  %1099 = vperm.xlu1 %1462, %v1064_v18   ;;  %v1075_v31 = vsub.f32 %v2178_v38, %v1050_v63  ;;  %v1076_v1 = vsub.f32 %v2182_v41, %v1050_v63 }
 0x3f3   : > { %1102 = vperm.xlu1 %1462, %v1065_v33  }
 0x3f7   : > { %1105 = vperm.xlu1 %1462, %v1066_v12  }
 0x3fb   : > { %1108 = vperm.xlu1 %1462, %v1067_v39  }
 0x3ff   : > { %1111 = vperm.xlu1 %1462, %v1068_v48  }
 0x403   : > { %1114 = vperm.xlu1 %1462, %v1069_v25  }
 0x407   : > { %1117 = vperm.xlu1 %1462, %v1070_v3  }
 0x40b   : > { %1123 = vperm.xlu1 %1462, %v1072_v57  }
 0x40f   : > { %1126 = vperm.xlu1 %1462, %v1073_v27  }
 0x413   : > { %1129 = vperm.xlu1 %1462, %v1074_v62  }
 0x417   : > { %1132 = vperm.xlu1 %1462, %v1075_v31  }
 0x41b   : > { %1135 = vperm.xlu1 %1462, %v1076_v1  }
 0x41f   : > { %1138 = vperm.xlu1 %1462, %v1077_v8  }
 0x46a   : > { %v1097_v51 = vpop.permute.xlu1 %1096  ;;  %v1121_v16 = vpop.permute.xlu0 %1120 }
 0x46b   : > { %v1146_v45 = vrot.slane %v1097_v51, %v1947_v6  ;;  %v1182_v50 = vrot.slane %v1121_v16, %v1947_v6 }
 0x46e   : > { %v1100_v35 = vpop.permute.xlu1 %1099  ;;  %v1142_v17 = vpop.permute.xlu0 %1141 }
 0x46f   : > { %v1150_v43 = vrot.slane %v1100_v35, %v1951_v9  ;;  %v1213_v10 = vrot.slane %v1142_v17, %v1951_v9 }
 0x471   : > { %v1151_v49 = vsel %vm700_vm0, %v1150_v43, %v1146_v45 }
 0x472   : > { %v1103_v22 = vpop.permute.xlu1 %1102 }
 0x473   : > { %v1155_v42 = vrot.slane %v1103_v22, %v1947_v6 }
 0x476   : > { %v1106_v19 = vpop.permute.xlu1 %1105 }
 0x477   : > { %v1159_v38 = vrot.slane %v1106_v19, %v1951_v9 }
 0x479   : > { %v1160_v46 = vsel %vm700_vm0, %v1159_v38, %v1155_v42 }
 0x47a   : > { %v1109_v28 = vpop.permute.xlu1 %1108  ;;  %v1215_v58 = vsel %vm765_vm1, %v1160_v46, %v1151_v49 }
 0x47b   : > { %v1164_v20 = vrot.slane %v1109_v28, %v1947_v6 }
 0x47e   : > { %v1112_v30 = vpop.permute.xlu1 %1111 }
 0x47f   : > { %v1168_v41 = vrot.slane %v1112_v30, %v1951_v9 }
 0x481   : > { %v1169_v52 = vsel %vm700_vm0, %v1168_v41, %v1164_v20 }
 0x482   : > { %v1115_v32 = vpop.permute.xlu1 %1114  ;;  %v1216_v61 = vsel %vm767_vm2, %v1169_v52, %v1215_v58 }
 0x483   : > { %v1173_v26 = vrot.slane %v1115_v32, %v1947_v6 }
 0x486   : > { %v1118_v34 = vpop.permute.xlu1 %1117 }
 0x487   : > { %v1177_v24 = vrot.slane %v1118_v34, %v1951_v9 }
 0x489   : > { %v1178_v54 = vsel %vm700_vm0, %v1177_v24, %v1173_v26 }
 0x48a   : > { %v1124_v7 = vpop.permute.xlu1 %1123  ;;  %v1217_v0 = vsel %vm769_vm3, %v1178_v54, %v1216_v61 }
 0x48b   : > { %v1186_v44 = vrot.slane %v1124_v7, %v1951_v9 }
 0x48d   : > { %v1187_v29 = vsel %vm700_vm0, %v1186_v44, %v1182_v50 }
 0x48e   : > { %v1127_v37 = vpop.permute.xlu1 %1126  ;;  %v1218_v11 = vsel %vm771_vm4, %v1187_v29, %v1217_v0 }
 0x48f   : > { %v1191_v55 = vrot.slane %v1127_v37, %v1947_v6 }
 0x492   : > { %v1130_v36 = vpop.permute.xlu1 %1129 }
 0x493   : > { %v1195_v47 = vrot.slane %v1130_v36, %v1951_v9 }
 0x495   : > { %v1196_v2 = vsel %vm700_vm0, %v1195_v47, %v1191_v55 }
 0x496   : > { %v1133_v40 = vpop.permute.xlu1 %1132  ;;  %v1219_v15 = vsel %vm773_vm5, %v1196_v2, %v1218_v11 }
 0x497   : > { %v1200_v60 = vrot.slane %v1133_v40, %v1947_v6 }
 0x49a   : > { %v1136_v23 = vpop.permute.xlu1 %1135 }
 0x49b   : > { %v1204_v59 = vrot.slane %v1136_v23, %v1951_v9 }
 0x49d   : > { %v1205_v4 = vsel %vm700_vm0, %v1204_v59, %v1200_v60 }
 0x49e   : > { %v1139_v5 = vpop.permute.xlu1 %1138  ;;  %v1220_v18 = vsel %vm775_vm6, %v1205_v4, %v1219_v15 }
 0x49f   : > { %v1209_v14 = vrot.slane %v1139_v5, %v1947_v6 }
 0x4a1   : > { %v1214_v21 = vsel %vm700_vm0, %v1213_v10, %v1209_v14 }
 0x4a2   : > { %v1221_v9 = vsel %vm777_vm7, %v1214_v21, %v1220_v18 }
 0x4a3   : > { %1223 = vst.msk [vmem:[%s306_s22] sm:$0xff] %vm780_vm8, %v1221_v9 }
 0x4a4   : > { %1633 = shalt.err (!%p1630_p13)
}
 0x4a5   : > { %s1634_s12 = scalar_lea.hbm %s2282_s19, 128  ;;  %s1638_s29 = scalar_lea.hbm %s2337_s4, 256 }
 0x4a6   : > { %p1635_p7 = scmp.ne.s32.totalorder %s2282_s19, %s1634_s12  ;;  %p1639_p5 = scmp.lt.u32.totalorder %s2282_s19, %s2337_s4 }
 0x4a7   : > { %p1640_p1 = scmp.lt.u32.totalorder %s1638_s29, %s1634_s12  ;;  %p1642_p0 = scmp.lt.u32.totalorder %s1634_s12, %s2282_s19 }
 0x4a8   : > { %p1636_p11 = pnand %p1635_p7, %p2364_p6 }
 0x4a9   : > { %p1641_p2 = por %p1640_p1, %p1639_p5 }
 0x4aa   : > { %p1637_p3 = pneg %p1636_p11 }
 0x4ab   : > { %p1643_p12 = por %p1642_p0, %p1641_p2 }
 0x4ad   : > { %p1644_p4 = pnand %p1643_p12, %p1637_p3 }
 0x4af   : > { %1647 = shalt.err (!%p1644_p4)
}
 0x4b0   : > { %1391 = dma.vmem_to_hbm [thread:$0]  (%p2364_p6), %s2284_s6, 128, %s2282_s19, %s1225_s18  }
 0x4b1 PF: > { %s1251_s25 = sand.u32 1, %s1686_s15   ;;  %p2365_p8 = scmp.ne.s32.totalorder %s2354_s30, 0 }
 0x4b2   : > { %p2366_p9 = scmp.ge.s32.totalorder %s1706_s20, 2  ;;  %s1252_s26 = scalar_lea.sflag [#allocation4], %s1251_s25 }
 0x4b4   : > { %p1404_p10 = pnand %p2366_p9, %p2365_p8 }
 0x4b6   : > { %1681 = dma.done.wait (!%p1404_p10), %s1252_s26, 128  }
 0x4b7   : > { %1683 = vsyncadd (!%p1404_p10), %s1252_s26, 4294967168  ;;  %s23_s20 = sadd.s32 1, %s1706_s20   ;;  %s2367_s23 = sld [smem:[#allocation12_spill]] }
 0x4b8   : > { %p20_p13 = scmp.ge.s32.totalorder %s23_s20, 4   ;;  %s2368_s17 = sld [smem:[#allocation15_spill]] }
 0x4b9   : > { %s2369_s18 = sld [smem:[#allocation13_spill]]  ;;  %s2370_s19 = sld [smem:[#allocation14_spill]] }
 0x4ba   : > { %s2371_s15 = smov %s1690_s16  ;;  %22 = sbr.rel (!%p20_p13) target bundleno = 11 (0xb), region = 105 }
 0x4bd   : > { %s2372_s16 = smov %s2367_s23 }
 0x4c1   :  { %1257 = vsyncpa [#allocation3], 1 }
 0x4c2   :  { %1259 = vsyncpa [#allocation3 + $0x1], 1 }
 0x4c3   :  { %1260 = vsyncpa [#allocation6], 1 }
 0x4c4   :  { %1262 = vsyncpa [#allocation6 + $0x1], 1 }
 0x4c5   :  { %1263 = vsyncpa [#allocation4], 1 }
 0x4c6   :  { %1265 = vsyncpa [#allocation4 + $0x1], 1 }

</bundles_post_ra>
